<compile_context>
chip_gen: v7x
topology: tpu7x:2x2x1
jax: 0.10.0
libtpu: 0.0.40
codegen_flags: <defaults>
</compile_context>

<pallas_src>
import jax
import jax.numpy as jnp
from jax.experimental import pallas as pl
from jax.experimental.pallas import tpu as pltpu

LANE = 128      # vreg lane width
SUBLANE = 8     # vreg sublane count
MAX_TB = 2048   # max batch-tile rows (2048 x 128 x 4B = 1 MiB per buffer -> trivial in VMEM)


def _round_up(n, m):
    return ((n + m - 1) // m) * m


# ---------------------------------------------------------------------------
# Kernel: fused  Linear(F,H) -> ReLU -> Linear(H,H) -> ReLU -> Linear(H,O)
# All three matmuls hit the MXU with f32 accumulation; bias-add / ReLU in f32.
# ---------------------------------------------------------------------------
def mlp_kernel(x_ref, w1_ref, b1_ref, w2_ref, b2_ref, w3_ref, b3_ref, o_ref):
    x = x_ref[...].astype(w1_ref.dtype)
    h1 = jnp.dot(x, w1_ref[...], preferred_element_type=jnp.float32)
    h1 = jnp.maximum(h1 + b1_ref[...], 0.0)
    h2 = jnp.dot(h1.astype(w2_ref.dtype), w2_ref[...],
                 preferred_element_type=jnp.float32)
    h2 = jnp.maximum(h2 + b2_ref[...], 0.0)
    out = jnp.dot(h2.astype(w3_ref.dtype), w3_ref[...],
                  preferred_element_type=jnp.float32)
    o_ref[...] = (out + b3_ref[...]).astype(o_ref.dtype)


def prepare_params(params, compute_dtype=jnp.float32):
    """One-time parameter preparation (call at setup time, NOT per forward).

    Zero-pads only the hidden dim to a multiple of 128 lanes (exact: padded weight
    rows/cols are zero and ReLU(0)=0). F and O stay unpadded (full-dim blocks).
    Optionally casts the matmul weights to bf16 (MXU-native on v5e/v6e/v7x);
    biases stay f32 so the bias-add/ReLU path is f32.
    """
    w1, b1, w2, b2, w3, b3 = params
    n_feature, n_hidden = w1.shape
    n_output = w3.shape[1]
    Hp = _round_up(n_hidden, LANE)

    def pad_to(a, rows, cols):
        return jnp.pad(a, ((0, rows - a.shape[0]), (0, cols - a.shape[1])))

    w1p = pad_to(w1, n_feature, Hp).astype(compute_dtype)
    w2p = pad_to(w2, Hp, Hp).astype(compute_dtype)
    w3p = pad_to(w3, Hp, n_output).astype(compute_dtype)
    b1p = pad_to(b1, 1, Hp).astype(jnp.float32)
    b2p = pad_to(b2, 1, Hp).astype(jnp.float32)
    b3p = b3.astype(jnp.float32)
    return (w1p, b1p, w2p, b2p, w3p, b3p)


def net_forward(x, padded_params, *, max_tile=MAX_TB):
    """3-layer MLP forward on pre-padded params (see prepare_params)."""
    w1p, b1p, w2p, b2p, w3p, b3p = padded_params
    batch, n_feature = x.shape
    Hp = w1p.shape[1]
    n_output = w3p.shape[1]

    # Batch tiling: large tiles (multiple of 8, up to max_tile). No batch padding:
    # a non-divisible boundary block is masked on writeback by Pallas.
    tb = min(max_tile, _round_up(batch, SUBLANE))
    # v7x megacore: prefer >= 2 tiles so the "parallel" axis can shard both TensorCores.
    if batch > SUBLANE and pl.cdiv(batch, tb) < 2:
        tb = _round_up(pl.cdiv(batch, 2), SUBLANE)
    n_tiles = pl.cdiv(batch, tb)

    # Weights/biases: constant block index -> VMEM-resident across grid steps.
    # Single-buffered (never changes) to halve their VMEM footprint.
    def resident(shape):
        return pl.BlockSpec(shape, lambda i: (0,) * len(shape),
                            pipeline_mode=pl.Buffered(1))

    flops = 2 * batch * (n_feature * Hp + Hp * Hp + Hp * n_output)
    bytes_accessed = (
        4 * (batch * n_feature + batch * n_output)                      # x in, out
        + w1p.size * w1p.dtype.itemsize + w2p.size * w2p.dtype.itemsize
        + w3p.size * w3p.dtype.itemsize                                 # weights
        + 4 * (2 * Hp + n_output)                                       # biases
    )

    # TODO(synk): for very large n_hidden (resident weights > ~1/2 VMEM, esp. v7x's
    # 64 MiB), add a grid axis over Hp ("arbitrary") with a VMEM f32 accumulator and
    # pl.when init/finalize instead of keeping all weights resident.
    return pl.pallas_call(
        mlp_kernel,
        out_shape=jax.ShapeDtypeStruct((batch, n_output), jnp.float32),
        grid_spec=pltpu.PrefetchScalarGridSpec(
            num_scalar_prefetch=0,
            grid=(n_tiles,),
            in_specs=[
                pl.BlockSpec((tb, n_feature), lambda i: (i, 0)),    # x tile (pipelined)
                resident((n_feature, Hp)), resident((1, Hp)),       # layer 1
                resident((Hp, Hp)), resident((1, Hp)),              # layer 2
                resident((Hp, n_output)), resident((1, n_output)),  # layer 3
            ],
            out_specs=pl.BlockSpec((tb, n_output), lambda i: (i, 0)),
        ),
        compiler_params=pltpu.CompilerParams(
            dimension_semantics=("parallel",),      # megacore sharding on v7x
            vmem_limit_bytes=32 * 1024 * 1024,      # safe default on v5e/v6e/v7x
        ),
        cost_estimate=pl.CostEstimate(
            flops=flops, transcendentals=0, bytes_accessed=bytes_accessed),
    )(x, w1p, b1p, w2p, b2p, w3p, b3p)


def init_linear(key, fan_in, fan_out):
    """Deterministic PyTorch-style Linear init (uniform +-1/sqrt(fan_in)).
    Weight is returned already transposed to (fan_in, fan_out)."""
    kw, kb = jax.random.split(key)
    bound = 1.0 / jnp.sqrt(jnp.float32(fan_in))
    w = jax.random.uniform(kw, (fan_in, fan_out), jnp.float32, -bound, bound)
    b = jax.random.uniform(kb, (1, fan_out), jnp.float32, -bound, bound)
    return w, b


if __name__ == "__main__":
    # Small shapes consistent with the module: Net(n_feature, n_hidden, n_output)
    batch, n_feature, n_hidden, n_output = 8, 16, 32, 8

    root = jax.random.PRNGKey(0)
    kx, k1, k2, k3 = jax.random.split(root, 4)

    x = jax.random.normal(kx, (batch, n_feature), jnp.float32)
    w1, b1 = init_linear(k1, n_feature, n_hidden)
    w2, b2 = init_linear(k2, n_hidden, n_hidden)
    w3, b3 = init_linear(k3, n_hidden, n_output)
    params = (w1, b1, w2, b2, w3, b3)

    # One-time param prep (padding hoisted out of the per-call forward path).
    padded_params = prepare_params(params)

    out = net_forward(x, padded_params)
    out = jax.block_until_ready(out)

    # Pure-JAX reference check (f32 everywhere -> tight tolerance holds).
    ref = jnp.maximum(x @ w1 + b1, 0.0)
    ref = jnp.maximum(ref @ w2 + b2, 0.0)
    ref = ref @ w3 + b3
    assert out.shape == (batch, n_output)
    assert jnp.allclose(out, ref, atol=1e-5, rtol=1e-5)

    print("KERNEL_OK")
</pallas_src>

<mosaic_0001>
module attributes {stable_mosaic.version = 11 : i64} {
  func.func @mlp_kernel(%arg0: i32, %arg1: memref<8x16xf32, #tpu.memory_space<vmem>>, %arg2: memref<16x128xf32, #tpu.memory_space<vmem>>, %arg3: memref<1x128xf32, #tpu.memory_space<vmem>>, %arg4: memref<128x128xf32, #tpu.memory_space<vmem>>, %arg5: memref<1x128xf32, #tpu.memory_space<vmem>>, %arg6: memref<128x8xf32, #tpu.memory_space<vmem>>, %arg7: memref<1x8xf32, #tpu.memory_space<vmem>>, %arg8: memref<8x8xf32, #tpu.memory_space<vmem>>) attributes {dimension_semantics = [#tpu.dimension_semantics<parallel>], iteration_bounds = array<i64: 1>, scalar_prefetch = 0 : i64, scratch_operands = 0 : i64, tpu.core_type = #tpu.core_type<tc>, window_params = [{transform_indices = @transform_0, window_bounds = array<i64: 8, 16>}, {pipeline_mode = #tpu.pipeline_mode<synchronous>, transform_indices = @transform_1, window_bounds = array<i64: 16, 128>}, {pipeline_mode = #tpu.pipeline_mode<synchronous>, transform_indices = @transform_2, window_bounds = array<i64: 1, 128>}, {pipeline_mode = #tpu.pipeline_mode<synchronous>, transform_indices = @transform_3, window_bounds = array<i64: 128, 128>}, {pipeline_mode = #tpu.pipeline_mode<synchronous>, transform_indices = @transform_4, window_bounds = array<i64: 1, 128>}, {pipeline_mode = #tpu.pipeline_mode<synchronous>, transform_indices = @transform_5, window_bounds = array<i64: 128, 8>}, {pipeline_mode = #tpu.pipeline_mode<synchronous>, transform_indices = @transform_6, window_bounds = array<i64: 1, 8>}, {transform_indices = @transform_7, window_bounds = array<i64: 8, 8>}]} {
    %c0 = arith.constant 0 : index
    %c0_0 = arith.constant 0 : index
    %0 = vector.load %arg1[%c0, %c0_0] : memref<8x16xf32, #tpu.memory_space<vmem>>, vector<8x16xf32>
    %c0_1 = arith.constant 0 : index
    %c0_2 = arith.constant 0 : index
    %1 = vector.load %arg2[%c0_1, %c0_2] : memref<16x128xf32, #tpu.memory_space<vmem>>, vector<16x128xf32>
    %cst = arith.constant dense<0.000000e+00> : vector<8x128xf32>
    %2 = tpu.matmul %0, %1, %cst {dimension_numbers = #tpu.dot_dimension_numbers<[1], [0], [0], [1], [0, 0, 1, 1], [], []>} : vector<8x16xf32>, vector<16x128xf32>, vector<8x128xf32> -> vector<8x128xf32>
    %c0_3 = arith.constant 0 : index
    %c0_4 = arith.constant 0 : index
    %3 = vector.load %arg3[%c0_3, %c0_4] : memref<1x128xf32, #tpu.memory_space<vmem>>, vector<1x128xf32>
    %4 = vector.broadcast %3 : vector<1x128xf32> to vector<8x128xf32>
    %5 = arith.addf %2, %4 : vector<8x128xf32>
    %cst_5 = arith.constant 0.000000e+00 : f32
    %6 = vector.broadcast %cst_5 : f32 to vector<8x128xf32>
    %7 = arith.maximumf %5, %6 : vector<8x128xf32>
    %c0_6 = arith.constant 0 : index
    %c0_7 = arith.constant 0 : index
    %8 = vector.load %arg4[%c0_6, %c0_7] : memref<128x128xf32, #tpu.memory_space<vmem>>, vector<128x128xf32>
    %cst_8 = arith.constant dense<0.000000e+00> : vector<8x128xf32>
    %9 = tpu.matmul %7, %8, %cst_8 {dimension_numbers = #tpu.dot_dimension_numbers<[1], [0], [0], [1], [0, 0, 1, 1], [], []>} : vector<8x128xf32>, vector<128x128xf32>, vector<8x128xf32> -> vector<8x128xf32>
    %c0_9 = arith.constant 0 : index
    %c0_10 = arith.constant 0 : index
    %10 = vector.load %arg5[%c0_9, %c0_10] : memref<1x128xf32, #tpu.memory_space<vmem>>, vector<1x128xf32>
    %11 = vector.broadcast %10 : vector<1x128xf32> to vector<8x128xf32>
    %12 = arith.addf %9, %11 : vector<8x128xf32>
    %cst_11 = arith.constant 0.000000e+00 : f32
    %13 = vector.broadcast %cst_11 : f32 to vector<8x128xf32>
    %14 = arith.maximumf %12, %13 : vector<8x128xf32>
    %c0_12 = arith.constant 0 : index
    %c0_13 = arith.constant 0 : index
    %15 = vector.load %arg6[%c0_12, %c0_13] : memref<128x8xf32, #tpu.memory_space<vmem>>, vector<128x8xf32>
    %cst_14 = arith.constant dense<0.000000e+00> : vector<8x8xf32>
    %16 = tpu.matmul %14, %15, %cst_14 {dimension_numbers = #tpu.dot_dimension_numbers<[1], [0], [0], [1], [0, 0, 1, 1], [], []>} : vector<8x128xf32>, vector<128x8xf32>, vector<8x8xf32> -> vector<8x8xf32>
    %c0_15 = arith.constant 0 : index
    %c0_16 = arith.constant 0 : index
    %17 = vector.load %arg7[%c0_15, %c0_16] : memref<1x8xf32, #tpu.memory_space<vmem>>, vector<1x8xf32>
    %18 = vector.broadcast %17 : vector<1x8xf32> to vector<8x8xf32>
    %19 = arith.addf %16, %18 : vector<8x8xf32>
    %c0_17 = arith.constant 0 : index
    %c0_18 = arith.constant 0 : index
    %20 = vector.load %arg8[%c0_17, %c0_18] : memref<8x8xf32, #tpu.memory_space<vmem>>, vector<8x8xf32>
    tpu.vector_store %arg8[%c0_17, %c0_18], %19 {strides = array<i32>} : memref<8x8xf32, #tpu.memory_space<vmem>>, vector<8x8xf32>,
    return
  }
  func.func @transform_0(%arg0: i32) -> (i32, i32) {
    %c0_i32 = arith.constant 0 : i32
    %c0_i32_0 = arith.constant 0 : i32
    return %arg0, %c0_i32 : i32, i32
  }
  func.func @transform_1(%arg0: i32) -> (i32, i32) {
    %c0_i32 = arith.constant 0 : i32
    %c0_i32_0 = arith.constant 0 : i32
    %c0_i32_1 = arith.constant 0 : i32
    return %c0_i32, %c0_i32_0 : i32, i32
  }
  func.func @transform_2(%arg0: i32) -> (i32, i32) {
    %c0_i32 = arith.constant 0 : i32
    %c0_i32_0 = arith.constant 0 : i32
    %c0_i32_1 = arith.constant 0 : i32
    return %c0_i32, %c0_i32_0 : i32, i32
  }
  func.func @transform_3(%arg0: i32) -> (i32, i32) {
    %c0_i32 = arith.constant 0 : i32
    %c0_i32_0 = arith.constant 0 : i32
    %c0_i32_1 = arith.constant 0 : i32
    return %c0_i32, %c0_i32_0 : i32, i32
  }
  func.func @transform_4(%arg0: i32) -> (i32, i32) {
    %c0_i32 = arith.constant 0 : i32
    %c0_i32_0 = arith.constant 0 : i32
    %c0_i32_1 = arith.constant 0 : i32
    return %c0_i32, %c0_i32_0 : i32, i32
  }
  func.func @transform_5(%arg0: i32) -> (i32, i32) {
    %c0_i32 = arith.constant 0 : i32
    %c0_i32_0 = arith.constant 0 : i32
    %c0_i32_1 = arith.constant 0 : i32
    return %c0_i32, %c0_i32_0 : i32, i32
  }
  func.func @transform_6(%arg0: i32) -> (i32, i32) {
    %c0_i32 = arith.constant 0 : i32
    %c0_i32_0 = arith.constant 0 : i32
    %c0_i32_1 = arith.constant 0 : i32
    return %c0_i32, %c0_i32_0 : i32, i32
  }
  func.func @transform_7(%arg0: i32) -> (i32, i32) {
    %c0_i32 = arith.constant 0 : i32
    %c0_i32_0 = arith.constant 0 : i32
    return %arg0, %c0_i32 : i32, i32
  }
}

</mosaic_0001>

<bundles_post_ra>
// kernel: tpu_custom_call.1
= control target key start
LH: loop header
LB: loop body
LE: loop exit
PB: predicated region body
PF: predicated region fallthrough
CT: control target
= control target key end

     0   :  { %12 = vsyncpa [#allocation3], 0  ;;  %s750_s0 = inlined_call_operand.hbm [shape: f32[8,16], index: 0, kind: input, shape index: {}]   ;;  %s751_s1 = inlined_call_operand.vmem [shape: f32[16,128], index: 1, kind: input, shape index: {}]   ;;  %s752_s2 = inlined_call_operand.vmem [shape: f32[1,128], index: 2, kind: input, shape index: {}]   ;;  %s753_s3 = inlined_call_operand.vmem [shape: f32[128,128], index: 3, kind: input, shape index: {}]   ;;  %s754_s4 = inlined_call_operand.vmem [shape: f32[1,128], index: 4, kind: input, shape index: {}]   ;;  %s755_s5 = inlined_call_operand.vmem [shape: f32[128,8], index: 5, kind: input, shape index: {}]   ;;  %s756_s6 = inlined_call_operand.vmem [shape: f32[1,8], index: 6, kind: input, shape index: {}]   ;;  %s757_s7 = inlined_call_operand.hbm [shape: f32[8,8], index: 7, kind: output, shape index: {}]  }
   0x1   :  { %13 = vsyncpa [#allocation4], 0  ;;  %s550_s24 = smov [#allocation2]   ;;  %s502_s28 = scalar_lea.hbm %s750_s0, 128 }
   0x2   :  { %s20_s25 = sshll.u32 %s550_s24, 4  ;;  %p503_p0 = scmp.ne.s32.totalorder %s750_s0, %s502_s28  ;;  %s21_s25 = int_to_ptr.vmem [resolvable:$true] %s20_s25 }
   0x3   :  { %p506_p1 = scmp.lt.u32.totalorder %s502_s28, %s750_s0 }
   0x5   :  { %p508_p2 = pnand %p506_p1, %p503_p0 }
   0x7   :  { %511 = shalt.err (!%p508_p2)
}
   0x8   :  { %s512_s10 = scalar_lea.vmem %s21_s25, 128  ;;  %p517_p4 = scmp.lt.s32.totalorder %s21_s25, %s21_s25 }
   0x9   :  { %p513_p3 = scmp.ne.s32.totalorder %s21_s25, %s512_s10  ;;  %p518_p5 = scmp.lt.s32.totalorder %s512_s10, %s512_s10 }
   0xb   :  { %p519_p6 = por %p518_p5, %p517_p4 }
   0xd   :  { %p520_p7 = pnand %p519_p6, %p513_p3 }
   0xf   :  { %523 = shalt.err (!%p520_p7)
}
  0x10   :  { %23 = dma.hbm_to_vmem [thread:$0]  %s750_s0, 128, %s21_s25, [#allocation3]  }
  0x11   :  { %546 = dma.done.wait [#allocation3], 128  }
  0x12   :  { %547 = vsyncadd [#allocation3], 4294967168  ;;  %v551_v0 = vmov 0.0|0.0   ;;  %vm552_vm0 = vmmov 0   ;;  %v553_v1 = vmov 0.0   ;;  %v40_v2 = vld [vmem:[%s751_s1] sm:$0xff] }
  0x13   :  { %446 = vmatprep.subr.bf16.mxu0 %v551_v0  ;;  %373 = vmatprep.mubr.msk.f32.mxu0 %vm552_vm0, %v553_v1  ;;  %v41_v3 = vld [vmem:[%s751_s1 + $0x8] sm:$0xff]  ;;  %v124_v5 = vld [vmem:[%s753_s3] sm:$0xff]  ;;  %v126_v7 = vld [vmem:[%s753_s3 + $0x10] sm:$0xff]  ;;  %vm49_vm1 = vcmask 130048   ;;  %s554_s9 = smov [#allocation5]   ;;  %vm311_vm2 = vcmask 64512  }
  0x14   :  { %449 = vmatprep.subr.bf16.mxu1 %v551_v0  ;;  %408 = vmatprep.mubr.msk.f32.mxu1 %vm552_vm0, %v553_v1  ;;  %v447_v4 = vpack.c.bf16 %v41_v3, %v40_v2  ;;  %v125_v6 = vld [vmem:[%s753_s3 + $0x8] sm:$0xff]  ;;  %v127_v9 = vld [vmem:[%s753_s3 + $0x18] sm:$0xff]  ;;  %v39_v10 = vld [vmem:[#allocation2] sm:$0xff]  ;;  %s319_s10 = sshll.u32 %s554_s9, 4  ;;  %s320_s10 = int_to_ptr.vmem [resolvable:$true] %s319_s10 }
  0x15   :  { %v450_v8 = vpack.c.bf16 %v125_v6, %v124_v5  ;;  %v453_v11 = vpack.c.bf16 %v127_v9, %v126_v7  ;;  %v128_v12 = vld [vmem:[%s753_s3 + $0x20] sm:$0xff]  ;;  %v129_v13 = vld [vmem:[%s753_s3 + $0x28] sm:$0xff]  ;;  %v130_v15 = vld [vmem:[%s753_s3 + $0x30] sm:$0xff]  ;;  %p529_p9 = scmp.lt.s32.totalorder %s320_s10, %s320_s10 }
  0x16   :  { %448 = vmatpush3.bf16.msra.mxu0 %v447_v4  ;;  %v456_v14 = vpack.c.bf16 %v129_v13, %v128_v12  ;;  %v131_v16 = vld [vmem:[%s753_s3 + $0x38] sm:$0xff]  ;;  %v132_v18 = vld [vmem:[%s753_s3 + $0x40] sm:$0xff]  ;;  %v133_v19 = vld [vmem:[%s753_s3 + $0x48] sm:$0xff] }
  0x17   :  { %451 = vmatpush3.bf16.msra.mxu1 %v450_v8  ;;  %473 = vmatprep.subr.bf16.mxu0 %v551_v0  ;;  %v459_v17 = vpack.c.bf16 %v131_v16, %v130_v15  ;;  %v462_v20 = vpack.c.bf16 %v133_v19, %v132_v18  ;;  %v134_v21 = vld [vmem:[%s753_s3 + $0x50] sm:$0xff]  ;;  %v135_v22 = vld [vmem:[%s753_s3 + $0x58] sm:$0xff]  ;;  %v136_v24 = vld [vmem:[%s753_s3 + $0x60] sm:$0xff] }
  0x18   :  { %452 = vmatprep.subr.bf16.mxu1 %v551_v0  ;;  %v465_v23 = vpack.c.bf16 %v135_v22, %v134_v21  ;;  %v137_v25 = vld [vmem:[%s753_s3 + $0x68] sm:$0xff]  ;;  %v138_v27 = vld [vmem:[%s753_s3 + $0x70] sm:$0xff]  ;;  %v139_v28 = vld [vmem:[%s753_s3 + $0x78] sm:$0xff] }
  0x19   :  { %374 = vmatmul.mubr.msk.f32.vlgmr.msra.gmra.mrb[0].mxu0 %vm49_vm1, %v39_v10  ;;  %v468_v26 = vpack.c.bf16 %v137_v25, %v136_v24  ;;  %v471_v29 = vpack.c.bf16 %v139_v28, %v138_v27  ;;  %v218_v30 = vld [vmem:[%s755_s5] sm:$0xff]  ;;  %v219_v31 = vld [vmem:[%s755_s5 + $0x8] sm:$0xff]  ;;  %v220_v32 = vld [vmem:[%s755_s5 + $0x10] sm:$0xff] }
  0x1a   :  { %443 = vmatprep.mubr.msk.f32.mxu0 %vm552_vm0, %v553_v1  ;;  %v474_v33 = vpack.c.bf16 %v219_v31, %v218_v30  ;;  %v221_v34 = vld [vmem:[%s755_s5 + $0x18] sm:$0xff]  ;;  %v222_v36 = vld [vmem:[%s755_s5 + $0x20] sm:$0xff]  ;;  %v223_v37 = vld [vmem:[%s755_s5 + $0x28] sm:$0xff] }
  0x1b   :  { %454 = vmatpush3.bf16.msra.mxu1 %v453_v11  ;;  %v477_v35 = vpack.c.bf16 %v221_v34, %v220_v32  ;;  %v480_v38 = vpack.c.bf16 %v223_v37, %v222_v36  ;;  %v224_v39 = vld [vmem:[%s755_s5 + $0x30] sm:$0xff]  ;;  %v225_v40 = vld [vmem:[%s755_s5 + $0x38] sm:$0xff]  ;;  %v226_v42 = vld [vmem:[%s755_s5 + $0x40] sm:$0xff] }
  0x1c   :  { %455 = vmatprep.subr.bf16.mxu1 %v551_v0  ;;  %475 = vmatpush3.bf16.msra.mxu0 %v474_v33  ;;  %v483_v41 = vpack.c.bf16 %v225_v40, %v224_v39  ;;  %v227_v43 = vld [vmem:[%s755_s5 + $0x48] sm:$0xff]  ;;  %v228_v45 = vld [vmem:[%s755_s5 + $0x50] sm:$0xff]  ;;  %v229_v46 = vld [vmem:[%s755_s5 + $0x58] sm:$0xff] }
  0x1d   :  { %476 = vmatprep.subr.bf16.mxu0 %v551_v0  ;;  %v486_v44 = vpack.c.bf16 %v227_v43, %v226_v42  ;;  %v489_v47 = vpack.c.bf16 %v229_v46, %v228_v45  ;;  %v230_v48 = vld [vmem:[%s755_s5 + $0x60] sm:$0xff]  ;;  %v231_v49 = vld [vmem:[%s755_s5 + $0x68] sm:$0xff]  ;;  %v232_v56 = vld [vmem:[%s755_s5 + $0x70] sm:$0xff] }
  0x1e   :  { %v492_v50 = vpack.c.bf16 %v231_v49, %v230_v48  ;;  %v328_v51 = vld [vmem:[%s752_s2] ss:$0 sm:$0xff]  ;;  %v233_v57 = vld [vmem:[%s755_s5 + $0x78] sm:$0xff]  ;;  %s524_s5 = scalar_lea.vmem %s320_s10, 128 }
  0x1f   :  { %457 = vmatpush3.bf16.msra.mxu1 %v456_v14  ;;  %v495_v58 = vpack.c.bf16 %v233_v57, %v232_v56  ;;  %v330_v59 = vld [vmem:[%s754_s4] ss:$0 sm:$0xff]  ;;  %p525_p8 = scmp.ne.s32.totalorder %s320_s10, %s524_s5  ;;  %p530_p10 = scmp.lt.s32.totalorder %s524_s5, %s524_s5 }
  0x20   :  { %458 = vmatprep.subr.bf16.mxu1 %v551_v0  ;;  %478 = vmatpush3.bf16.msra.mxu0 %v477_v35 }
  0x21   :  { %479 = vmatprep.subr.bf16.mxu0 %v551_v0  ;;  %p531_p11 = por %p530_p10, %p529_p9 }
  0x23   :  { %460 = vmatpush3.bf16.msra.mxu1 %v459_v17  ;;  %p532_p12 = pnand %p531_p11, %p525_p8 }
  0x24   :  { %461 = vmatprep.subr.bf16.mxu1 %v551_v0  ;;  %481 = vmatpush3.bf16.msra.mxu0 %v480_v38 }
  0x25   :  { %482 = vmatprep.subr.bf16.mxu0 %v551_v0 }
  0x27   :  { %463 = vmatpush3.bf16.msra.mxu1 %v462_v20 }
  0x28   :  { %464 = vmatprep.subr.bf16.mxu1 %v551_v0  ;;  %484 = vmatpush3.bf16.msra.mxu0 %v483_v41 }
  0x29   :  { %485 = vmatprep.subr.bf16.mxu0 %v551_v0 }
  0x2b   :  { %466 = vmatpush3.bf16.msra.mxu1 %v465_v23 }
  0x2c   :  { %467 = vmatprep.subr.bf16.mxu1 %v551_v0  ;;  %487 = vmatpush3.bf16.msra.mxu0 %v486_v44 }
  0x2d   :  { %488 = vmatprep.subr.bf16.mxu0 %v551_v0 }
  0x2f   :  { %469 = vmatpush3.bf16.msra.mxu1 %v468_v26 }
  0x30   :  { %470 = vmatprep.subr.bf16.mxu1 %v551_v0  ;;  %490 = vmatpush3.bf16.msra.mxu0 %v489_v47 }
  0x31   :  { %491 = vmatprep.subr.bf16.mxu0 %v551_v0 }
  0x33   :  { %472 = vmatpush3.bf16.msra.mxu1 %v471_v29 }
  0x34   :  { %493 = vmatpush3.bf16.msra.mxu0 %v492_v50 }
  0x35   :  { %494 = vmatprep.subr.bf16.mxu0 %v551_v0  ;;  %v331_v0 = vld [vmem:[%s756_s6] ss:$0 sm:$0xff] }
  0x38   :  { %496 = vmatpush3.bf16.msra.mxu0 %v495_v58 }
  0xec   :  { %v119_v52 = vpop.f32.mrb[0].mxu0 }
  0xed   :  { %v120_v53 = vadd.f32 %v328_v51, %v119_v52  ;;  %v375_v54 = vpop.f32.mrb[1].mxu0 }
  0xef   :  { %v123_v55 = vmax.f32 %v120_v53, 0.0 }
  0xf1   :  { %409 = vmatmul.mubr.f32.vlgmr.msra.gmra.mrb[0].mxu1 %v123_v55 }
 0x1c4   :  { %v213_v60 = vpop.f32.mrb[0].mxu1 }
 0x1c5   :  { %v214_v61 = vadd.f32 %v330_v59, %v213_v60  ;;  %v410_v62 = vpop.f32.mrb[1].mxu1 }
 0x1c7   :  { %v217_v63 = vmax.f32 %v214_v61, 0.0 }
 0x1c9   :  { %444 = vmatmul.mubr.f32.vlgmr.msra.gmra.mrb[2].mxu0 %v217_v63 }
 0x29c   :  { %v307_v1 = vpop.f32.mrb[2].mxu0 }
 0x29d   :  { %v308_v2 = vadd.f32 %v331_v0, %v307_v1  ;;  %v445_v3 = vpop.f32.mrb[3].mxu0 }
 0x29f   :  { %312 = vst.msk [vmem:[#allocation5] sm:$0xff] %vm311_vm2, %v308_v2 }
 0x2a0   :  { %535 = shalt.err (!%p532_p12)
}
 0x2a1   :  { %s536_s12 = scalar_lea.hbm %s757_s7, 128 }
 0x2a2   :  { %p537_p13 = scmp.ne.s32.totalorder %s757_s7, %s536_s12  ;;  %p540_p0 = scmp.lt.u32.totalorder %s536_s12, %s757_s7 }
 0x2a4   :  { %p542_p1 = pnand %p540_p0, %p537_p13 }
 0x2a6   :  { %545 = shalt.err (!%p542_p1)
}
 0x2a7   :  { %322 = dma.vmem_to_hbm [thread:$0]  %s320_s10, 128, %s757_s7, [#allocation4]  }
 0x2a8   :  { %548 = dma.done.wait [#allocation4], 128  }
 0x2a9   :  { %549 = vsyncadd [#allocation4], 4294967168 }
 0x2aa   :  { %326 = vsyncpa [#allocation3], 1 }
 0x2ab   :  { %327 = vsyncpa [#allocation4], 1 }

</bundles_post_ra>
